<compile_context>
chip_gen: v7x
topology: tpu7x:2x2x1
jax: 0.10.0
libtpu: 0.0.40
codegen_flags: <defaults>
</compile_context>

<pallas_src>
import jax
import jax.numpy as jnp
from jax import lax
from jax.experimental import pallas as pl
from jax.experimental.pallas import tpu as pltpu


def _make_graphconv_kernel(tb, R, F, O, *, add_self, normalize_embedding,
                           project_first, compute_dtype):
    eps2 = 1e-24  # (F.normalize eps = 1e-12) ** 2

    def kernel(x_ref, adj_ref, w_ref, b_ref, o_ref):
        # x_ref:   (tb, R, F)  pipelined batch tile, native layout
        # adj_ref: (R, R)      resident
        # w_ref:   (F, O)      resident
        # b_ref:   (1, O)      resident (f32)
        # o_ref:   (tb, R, O)  current output tile
        x = x_ref[...]
        w = w_ref[...].astype(compute_dtype)          # no-op when already bf16
        bias = b_ref[...].astype(jnp.float32)         # (1, O)
        # Broadcast adj once per step -> standard batched MXU matmul, no lane
        # slicing / concatenation.
        adj_b = jnp.broadcast_to(adj_ref[...].astype(compute_dtype)[None],
                                 (tb, R, R))

        if project_first:
            # Reassociated order (O < F):  adj @ (x W) == (adj @ x) W
            # (1) ONE folded projection matmul over the whole batch tile.
            xw = jnp.dot(x.reshape(tb * R, F).astype(compute_dtype), w,
                         preferred_element_type=jnp.float32)       # (tb*R, O)
            # (2) batched aggregation in the smaller O space.
            y3 = jnp.einsum("brs,bso->bro", adj_b,
                            xw.reshape(tb, R, O).astype(compute_dtype),
                            preferred_element_type=jnp.float32)    # (tb, R, O)
            y = y3.reshape(tb * R, O)
            if add_self:
                y = y + xw        # adj@(xW) + xW == (adj@x + x) @ W
        else:
            # Reference order (F <= O): aggregate, then ONE folded projection.
            agg = jnp.einsum("brs,bsf->brf", adj_b, x.astype(compute_dtype),
                             preferred_element_type=jnp.float32)   # (tb, R, F)
            if add_self:
                agg = agg + x.astype(jnp.float32)
            y = jnp.dot(agg.reshape(tb * R, F).astype(compute_dtype), w,
                        preferred_element_type=jnp.float32)        # (tb*R, O)

        # Epilogue on the full 2-D slab, then one lane-dense store.
        y = y + bias
        if normalize_embedding:
            ss = jnp.sum(y * y, axis=-1, keepdims=True)
            y = y * lax.rsqrt(jnp.maximum(ss, eps2))
        o_ref[...] = y.reshape(tb, R, O).astype(o_ref.dtype)

    return kernel


def _chip_vmem_policy():
    """Returns (per-step budget, vmem_limit cap, prefer >=2 grid steps)."""
    try:
        vmem = int(pltpu.get_tpu_info().vmem_capacity_bytes)
    except Exception:  # query unavailable -> be conservative (v7x sizing)
        vmem = 64 * 1024 * 1024
    if vmem <= 64 * 1024 * 1024:
        # v7x-class: 64 MiB VMEM, 2 TensorCores -> keep steps small and ensure
        # >= 2 grid steps so dimension_semantics=("parallel",) uses both cores.
        return 22 * 1024 * 1024, 48 * 1024 * 1024, True
    # v5e / v6e: 128 MiB VMEM, single TensorCore -> biggest tile that fits.
    return 96 * 1024 * 1024, 110 * 1024 * 1024, False


def _step_bytes(tb, R, F, O, x_bytes, c_bytes, out_bytes, resident_bufs):
    x_blk = 2 * tb * R * F * x_bytes                # pipelined x tile (2 bufs)
    o_blk = 2 * tb * R * O * out_bytes              # pipelined out tile (2 bufs)
    resident = resident_bufs * (R * R + F * O) * c_bytes + 2 * O * 4
    adj_bcast = tb * R * R * c_bytes                # broadcast adj (batched dot)
    temps = tb * R * (F + O) * (4 + c_bytes)        # f32 matmul results + casts
    return x_blk + o_blk + resident + adj_bcast + temps


def _pick_batch_tile(B, step_bytes_fn, budget, prefer_multi_step):
    divisors = [t for t in range(1, B + 1) if B % t == 0]
    fitting = [t for t in divisors if step_bytes_fn(t) <= budget]
    if not fitting:
        # TODO(synk): add a row-tile grid axis (adj (tr,R) / out (tb,tr,O)) once
        # even a single-batch tile overflows VMEM (very large R*F).
        return 1
    if prefer_multi_step:
        multi = [t for t in fitting if B // t >= 2]
        if multi:
            return max(multi)
    return max(fitting)


def graph_conv(x, adj, weight, bias=None, *, add_self=False,
               normalize_embedding=False, use_bf16_matmul=False):
    """Pallas GraphConv forward.  x:[B,R,F], adj:[R,R], weight:[F,O], bias:[O].

    use_bf16_matmul=True is recommended on v5e/v6e/v7x (bf16 MXU inputs, f32
    accumulation: halves x/adj HBM traffic and avoids multi-pass f32 matmuls);
    the default stays exact f32 to match the reference module.
    """
    B, R, F = x.shape
    O = weight.shape[-1]
    out_dtype = x.dtype
    compute_dtype = jnp.bfloat16 if use_bf16_matmul else jnp.float32

    if bias is None:
        bias = jnp.zeros((O,), dtype=jnp.float32)
    bias2d = bias.reshape(1, O).astype(jnp.float32)

    # Cast adj / W once in the wrapper (tiny); x only when bf16 is requested,
    # so the kernel streams half the bytes and does no per-step VPU casts.
    adj_c = adj.astype(compute_dtype)
    w_c = weight.astype(compute_dtype)
    x_c = x.astype(compute_dtype) if use_bf16_matmul else x

    budget, limit_cap, prefer_multi_step = _chip_vmem_policy()
    c_bytes = jnp.dtype(compute_dtype).itemsize
    x_bytes = jnp.dtype(x_c.dtype).itemsize
    out_bytes = jnp.dtype(out_dtype).itemsize
    step_fn = lambda t: _step_bytes(t, R, F, O, x_bytes, c_bytes, out_bytes,
                                    resident_bufs=1)
    tb = _pick_batch_tile(B, step_fn, budget, prefer_multi_step)
    nb = B // tb
    # vmem limit tracks the actual per-step estimate (with slack), per-chip cap.
    vmem_limit = int(min(limit_cap, max(1.5 * step_fn(tb), 16 * 1024 * 1024)))

    project_first = O < F   # free FLOP reduction: adj@(xW) == (adj@x)W
    kernel = _make_graphconv_kernel(
        tb, R, F, O, add_self=add_self,
        normalize_embedding=normalize_embedding,
        project_first=project_first, compute_dtype=compute_dtype)

    def _call(single_buffer_resident):
        res_kw = ({"pipeline_mode": pl.Buffered(1)}
                  if single_buffer_resident else {})
        grid_spec = pltpu.PrefetchScalarGridSpec(
            num_scalar_prefetch=0,
            grid=(nb,),
            in_specs=[
                pl.BlockSpec((tb, R, F), lambda b: (b, 0, 0)),      # x   (pipelined)
                pl.BlockSpec((R, R), lambda b: (0, 0), **res_kw),   # adj (resident)
                pl.BlockSpec((F, O), lambda b: (0, 0), **res_kw),   # W   (resident)
                pl.BlockSpec((1, O), lambda b: (0, 0), **res_kw),   # bias(resident)
            ],
            out_specs=pl.BlockSpec((tb, R, O), lambda b: (b, 0, 0)),
        )
        return pl.pallas_call(
            kernel,
            out_shape=jax.ShapeDtypeStruct((B, R, O), out_dtype),
            grid_spec=grid_spec,
            compiler_params=pltpu.CompilerParams(
                dimension_semantics=("parallel",),
                vmem_limit_bytes=vmem_limit,
            ),
        )(x_c, adj_c, w_c, bias2d)

    try:
        # Resident inputs single-buffered (constant index maps) to save VMEM.
        return _call(True)
    except Exception:
        # Fall back to default double buffering if Buffered(1) is rejected by
        # the installed jax / Mosaic pipeliner.
        return _call(False)


def graph_conv_ref(x, adj, weight, bias=None, *, add_self=False,
                   normalize_embedding=False):
    """Pure-JAX reference matching the PyTorch forward."""
    y = jnp.einsum("rs,bsf->brf", adj, x)
    if add_self:
        y = y + x
    y = jnp.einsum("brf,fo->bro", y, weight)
    if bias is not None:
        y = y + bias
    if normalize_embedding:
        norm = jnp.sqrt(jnp.sum(y * y, axis=-1, keepdims=True))
        y = y / jnp.maximum(norm, 1e-12)
    return y


if __name__ == "__main__":
    # Small deterministic shapes: batch=2, roinum=16, input_dim=32, output_dim=32
    B, R, IN_DIM, OUT_DIM = 2, 16, 32, 32

    key = jax.random.PRNGKey(0)
    k_x, k_adj, k_w, k_b, k_w2, k_b2 = jax.random.split(key, 6)

    x = jax.random.normal(k_x, (B, R, IN_DIM), dtype=jnp.float32)
    # Symmetric row-normalized adjacency (dense stand-in for torch.sparse.mm)
    adj_raw = (jax.random.uniform(k_adj, (R, R)) > 0.7).astype(jnp.float32)
    adj = adj_raw + adj_raw.T + jnp.eye(R, dtype=jnp.float32)
    adj = adj / jnp.maximum(jnp.sum(adj, axis=1, keepdims=True), 1.0)

    weight = jax.random.normal(k_w, (IN_DIM, OUT_DIM), dtype=jnp.float32) * 0.1
    bias = jax.random.normal(k_b, (OUT_DIM,), dtype=jnp.float32) * 0.1

    # 1) Default flags (add_self=False, normalize_embedding=False, bias=True).
    out = jax.block_until_ready(graph_conv(x, adj, weight, bias))
    ref = graph_conv_ref(x, adj, weight, bias)
    assert out.shape == (B, R, OUT_DIM)
    assert jnp.allclose(out, ref, atol=1e-4, rtol=1e-4), "mismatch (default flags)"

    # 2) O < F exercises the reassociated (project-first) path plus the
    #    add_self / normalize_embedding epilogue.
    OUT2 = 16
    weight2 = jax.random.normal(k_w2, (IN_DIM, OUT2), dtype=jnp.float32) * 0.1
    bias2 = jax.random.normal(k_b2, (OUT2,), dtype=jnp.float32) * 0.1
    out2 = jax.block_until_ready(
        graph_conv(x, adj, weight2, bias2, add_self=True,
                   normalize_embedding=True))
    ref2 = graph_conv_ref(x, adj, weight2, bias2, add_self=True,
                          normalize_embedding=True)
    assert out2.shape == (B, R, OUT2)
    assert jnp.allclose(out2, ref2, atol=1e-3, rtol=1e-3), "mismatch (project-first path)"

    # 3) bf16 MXU inputs (recommended on v5e/v6e/v7x), f32 accumulation.
    out3 = jax.block_until_ready(
        graph_conv(x, adj, weight, bias, use_bf16_matmul=True))
    assert jnp.allclose(out3, ref, atol=5e-2, rtol=5e-2), "mismatch (bf16 path)"

    # TODO(synk): training-time dropout (dropout > 0) is not implemented.
    print("KERNEL_OK")
</pallas_src>

<mosaic_0001>
module attributes {stable_mosaic.version = 11 : i64} {
  func.func @kernel(%arg0: i32, %arg1: memref<1x16x32xf32, #tpu.memory_space<vmem>>, %arg2: memref<16x16xf32, #tpu.memory_space<vmem>>, %arg3: memref<32x32xf32, #tpu.memory_space<vmem>>, %arg4: memref<1x32xf32, #tpu.memory_space<vmem>>, %arg5: memref<1x16x32xf32, #tpu.memory_space<vmem>>) attributes {dimension_semantics = [#tpu.dimension_semantics<parallel>], iteration_bounds = array<i64: 2>, scalar_prefetch = 0 : i64, scratch_operands = 0 : i64, tpu.core_type = #tpu.core_type<tc>, window_params = [{transform_indices = @transform_0, window_bounds = array<i64: 1, 16, 32>}, {pipeline_mode = #tpu.pipeline_mode<synchronous>, transform_indices = @transform_1, window_bounds = array<i64: 16, 16>}, {pipeline_mode = #tpu.pipeline_mode<synchronous>, transform_indices = @transform_2, window_bounds = array<i64: 32, 32>}, {pipeline_mode = #tpu.pipeline_mode<synchronous>, transform_indices = @transform_3, window_bounds = array<i64: 1, 32>}, {transform_indices = @transform_4, window_bounds = array<i64: 1, 16, 32>}]} {
    %c0 = arith.constant 0 : index
    %c0_0 = arith.constant 0 : index
    %c0_1 = arith.constant 0 : index
    %0 = vector.load %arg1[%c0, %c0_0, %c0_1] : memref<1x16x32xf32, #tpu.memory_space<vmem>>, vector<1x16x32xf32>
    %c0_2 = arith.constant 0 : index
    %c0_3 = arith.constant 0 : index
    %1 = vector.load %arg3[%c0_2, %c0_3] : memref<32x32xf32, #tpu.memory_space<vmem>>, vector<32x32xf32>
    %c0_4 = arith.constant 0 : index
    %c0_5 = arith.constant 0 : index
    %2 = vector.load %arg4[%c0_4, %c0_5] : memref<1x32xf32, #tpu.memory_space<vmem>>, vector<1x32xf32>
    %c0_6 = arith.constant 0 : index
    %c0_7 = arith.constant 0 : index
    %3 = vector.load %arg2[%c0_6, %c0_7] : memref<16x16xf32, #tpu.memory_space<vmem>>, vector<16x16xf32>
    %4 = vector.shape_cast %3 : vector<16x16xf32> to vector<1x16x16xf32>
    "tpu.trace_start"() <{level = 10 : i32, message = "brs,bsf->brf"}> : () -> ()
    %cst = arith.constant dense<0.000000e+00> : vector<1x16x32xf32>
    %5 = tpu.matmul %4, %0, %cst {dimension_numbers = #tpu.dot_dimension_numbers<[2], [1], [1], [2], [0, 0, 0, 1, 1, 2], [0], [0]>} : vector<1x16x16xf32>, vector<1x16x32xf32>, vector<1x16x32xf32> -> vector<1x16x32xf32>
    "tpu.trace_stop"() : () -> ()
    %6 = vector.shape_cast %5 : vector<1x16x32xf32> to vector<16x32xf32>
    %cst_8 = arith.constant dense<0.000000e+00> : vector<16x32xf32>
    %7 = tpu.matmul %6, %1, %cst_8 {dimension_numbers = #tpu.dot_dimension_numbers<[1], [0], [0], [1], [0, 0, 1, 1], [], []>} : vector<16x32xf32>, vector<32x32xf32>, vector<16x32xf32> -> vector<16x32xf32>
    %8 = vector.broadcast %2 : vector<1x32xf32> to vector<16x32xf32>
    %9 = arith.addf %7, %8 : vector<16x32xf32>
    %10 = vector.shape_cast %9 : vector<16x32xf32> to vector<1x16x32xf32>
    %c0_9 = arith.constant 0 : index
    %c0_10 = arith.constant 0 : index
    %c0_11 = arith.constant 0 : index
    %11 = vector.load %arg5[%c0_9, %c0_10, %c0_11] : memref<1x16x32xf32, #tpu.memory_space<vmem>>, vector<1x16x32xf32>
    tpu.vector_store %arg5[%c0_9, %c0_10, %c0_11], %10 {strides = array<i32>} : memref<1x16x32xf32, #tpu.memory_space<vmem>>, vector<1x16x32xf32>,
    return
  }
  func.func @transform_0(%arg0: i32) -> (i32, i32, i32) {
    %c0_i32 = arith.constant 0 : i32
    %c0_i32_0 = arith.constant 0 : i32
    %c0_i32_1 = arith.constant 0 : i32
    return %arg0, %c0_i32, %c0_i32_0 : i32, i32, i32
  }
  func.func @transform_1(%arg0: i32) -> (i32, i32) {
    %c0_i32 = arith.constant 0 : i32
    %c0_i32_0 = arith.constant 0 : i32
    %c0_i32_1 = arith.constant 0 : i32
    return %c0_i32, %c0_i32_0 : i32, i32
  }
  func.func @transform_2(%arg0: i32) -> (i32, i32) {
    %c0_i32 = arith.constant 0 : i32
    %c0_i32_0 = arith.constant 0 : i32
    %c0_i32_1 = arith.constant 0 : i32
    return %c0_i32, %c0_i32_0 : i32, i32
  }
  func.func @transform_3(%arg0: i32) -> (i32, i32) {
    %c0_i32 = arith.constant 0 : i32
    %c0_i32_0 = arith.constant 0 : i32
    %c0_i32_1 = arith.constant 0 : i32
    return %c0_i32, %c0_i32_0 : i32, i32
  }
  func.func @transform_4(%arg0: i32) -> (i32, i32, i32) {
    %c0_i32 = arith.constant 0 : i32
    %c0_i32_0 = arith.constant 0 : i32
    %c0_i32_1 = arith.constant 0 : i32
    return %arg0, %c0_i32, %c0_i32_0 : i32, i32, i32
  }
}

module attributes {stable_mosaic.version = 11 : i64} {
  func.func @kernel(%arg0: i32, %arg1: memref<1x16x32xf32, #tpu.memory_space<vmem>>, %arg2: memref<16x16xf32, #tpu.memory_space<vmem>>, %arg3: memref<32x32xf32, #tpu.memory_space<vmem>>, %arg4: memref<1x32xf32, #tpu.memory_space<vmem>>, %arg5: memref<1x16x32xf32, #tpu.memory_space<vmem>>) attributes {dimension_semantics = [#tpu.dimension_semantics<parallel>], iteration_bounds = array<i64: 2>, scalar_prefetch = 0 : i64, scratch_operands = 0 : i64, tpu.core_type = #tpu.core_type<tc>, window_params = [{transform_indices = @transform_0, window_bounds = array<i64: 1, 16, 32>}, {pipeline_mode = #tpu.pipeline_mode<synchronous>, transform_indices = @transform_1, window_bounds = array<i64: 16, 16>}, {pipeline_mode = #tpu.pipeline_mode<synchronous>, transform_indices = @transform_2, window_bounds = array<i64: 32, 32>}, {pipeline_mode = #tpu.pipeline_mode<synchronous>, transform_indices = @transform_3, window_bounds = array<i64: 1, 32>}, {transform_indices = @transform_4, window_bounds = array<i64: 1, 16, 32>}]} {
    %c0 = arith.constant 0 : index
    %c0_0 = arith.constant 0 : index
    %c0_1 = arith.constant 0 : index
    %0 = vector.load %arg1[%c0, %c0_0, %c0_1] : memref<1x16x32xf32, #tpu.memory_space<vmem>>, vector<1x16x32xf32>
    %c0_2 = arith.constant 0 : index
    %c0_3 = arith.constant 0 : index
    %1 = vector.load %arg3[%c0_2, %c0_3] : memref<32x32xf32, #tpu.memory_space<vmem>>, vector<32x32xf32>
    %c0_4 = arith.constant 0 : index
    %c0_5 = arith.constant 0 : index
    %2 = vector.load %arg4[%c0_4, %c0_5] : memref<1x32xf32, #tpu.memory_space<vmem>>, vector<1x32xf32>
    %c0_6 = arith.constant 0 : index
    %c0_7 = arith.constant 0 : index
    %3 = vector.load %arg2[%c0_6, %c0_7] : memref<16x16xf32, #tpu.memory_space<vmem>>, vector<16x16xf32>
    %4 = vector.shape_cast %3 : vector<16x16xf32> to vector<1x16x16xf32>
    "tpu.trace_start"() <{level = 10 : i32, message = "brs,bsf->brf"}> : () -> ()
    %cst = arith.constant dense<0.000000e+00> : vector<1x16x32xf32>
    %5 = tpu.matmul %4, %0, %cst {dimension_numbers = #tpu.dot_dimension_numbers<[2], [1], [1], [2], [0, 0, 0, 1, 1, 2], [0], [0]>} : vector<1x16x16xf32>, vector<1x16x32xf32>, vector<1x16x32xf32> -> vector<1x16x32xf32>
    "tpu.trace_stop"() : () -> ()
    %6 = vector.shape_cast %5 : vector<1x16x32xf32> to vector<16x32xf32>
    %cst_8 = arith.constant dense<0.000000e+00> : vector<16x32xf32>
    %7 = tpu.matmul %6, %1, %cst_8 {dimension_numbers = #tpu.dot_dimension_numbers<[1], [0], [0], [1], [0, 0, 1, 1], [], []>} : vector<16x32xf32>, vector<32x32xf32>, vector<16x32xf32> -> vector<16x32xf32>
    %8 = vector.broadcast %2 : vector<1x32xf32> to vector<16x32xf32>
    %9 = arith.addf %7, %8 : vector<16x32xf32>
    %10 = vector.shape_cast %9 : vector<16x32xf32> to vector<1x16x32xf32>
    %c0_9 = arith.constant 0 : index
    %c0_10 = arith.constant 0 : index
    %c0_11 = arith.constant 0 : index
    %11 = vector.load %arg5[%c0_9, %c0_10, %c0_11] : memref<1x16x32xf32, #tpu.memory_space<vmem>>, vector<1x16x32xf32>
    tpu.vector_store %arg5[%c0_9, %c0_10, %c0_11], %10 {strides = array<i32>} : memref<1x16x32xf32, #tpu.memory_space<vmem>>, vector<1x16x32xf32>,
    return
  }
  func.func @transform_0(%arg0: i32) -> (i32, i32, i32) {
    %c0_i32 = arith.constant 0 : i32
    %c0_i32_0 = arith.constant 0 : i32
    %c0_i32_1 = arith.constant 0 : i32
    return %arg0, %c0_i32, %c0_i32_0 : i32, i32, i32
  }
  func.func @transform_1(%arg0: i32) -> (i32, i32) {
    %c0_i32 = arith.constant 0 : i32
    %c0_i32_0 = arith.constant 0 : i32
    %c0_i32_1 = arith.constant 0 : i32
    return %c0_i32, %c0_i32_0 : i32, i32
  }
  func.func @transform_2(%arg0: i32) -> (i32, i32) {
    %c0_i32 = arith.constant 0 : i32
    %c0_i32_0 = arith.constant 0 : i32
    %c0_i32_1 = arith.constant 0 : i32
    return %c0_i32, %c0_i32_0 : i32, i32
  }
  func.func @transform_3(%arg0: i32) -> (i32, i32) {
    %c0_i32 = arith.constant 0 : i32
    %c0_i32_0 = arith.constant 0 : i32
    %c0_i32_1 = arith.constant 0 : i32
    return %c0_i32, %c0_i32_0 : i32, i32
  }
  func.func @transform_4(%arg0: i32) -> (i32, i32, i32) {
    %c0_i32 = arith.constant 0 : i32
    %c0_i32_0 = arith.constant 0 : i32
    %c0_i32_1 = arith.constant 0 : i32
    return %arg0, %c0_i32, %c0_i32_0 : i32, i32, i32
  }
}

</mosaic_0001>

<bundles_post_ra>
// kernel: tpu_custom_call.1
= control target key start
LH: loop header
LB: loop body
LE: loop exit
PB: predicated region body
PF: predicated region fallthrough
CT: control target
= control target key end

     0   :  { %9 = vsyncpa [#allocation3], 0  ;;  %s1115_s0 = inlined_call_operand.hbm [shape: f32[2,16,32], index: 0, kind: input, shape index: {}]   ;;  %s1116_s1 = inlined_call_operand.hbm [shape: f32[16,16], index: 1, kind: input, shape index: {}]   ;;  %s1117_s2 = inlined_call_operand.hbm [shape: f32[32,32], index: 2, kind: input, shape index: {}]   ;;  %s1118_s3 = inlined_call_operand.vmem [shape: f32[1,32], index: 3, kind: input, shape index: {}]   ;;  %s1119_s4 = inlined_call_operand.hbm [shape: f32[2,16,32], index: 4, kind: output, shape index: {}]  }
   0x1   :  { %11 = vsyncpa [#allocation3 + $0x1], 0 }
   0x2   :  { %12 = vsyncpa [#allocation6], 0 }
   0x3   :  { %13 = vsyncpa [#allocation4], 0 }
   0x4   :  { %15 = vsyncpa [#allocation4 + $0x1], 0  ;;  %s859_s15 = smov 0   ;;  %s861_s16 = smov 0  }
   0x5   :  { %s863_s17 = smov 0   ;;  %s865_s18 = smov 0  }
   0x6 LB: > { %s880_s19 = sadd.s32 4294967295, %s824_s18   ;;  %s532_s20 = sadd.s32 4294967294, %s824_s18   ;;  %s824_s18 = sphi %s865_s18, %s1139_s18   ;;  %s820_s17 = sphi %s863_s17, %s1138_s17   ;;  %s816_s16 = sphi %s861_s16, %s1137_s16   ;;  %s812_s15 = sphi %s859_s15, %s1136_s15  }
   0x7   : > { %p41_p0 = scmp.ne.s32.totalorder %s816_s16, %s812_s15  ;;  %p1120_p1 = scmp.eq.s32.totalorder %s880_s19, 0 }
   0x8   : > { %p134_p3 = scmp.eq.s32.totalorder %s532_s20, 1  ;;  %p533_p5 = scmp.ge.s32.totalorder %s824_s18, 1 }
   0x9   : > { %p889_p4 = por %p1120_p1, %p41_p0  ;;  %p141_p7 = scmp.lt.s32.totalorder %s824_s18, 3 }
   0xa   : > { %p894_p6 = por %p134_p3, %p41_p0  ;;  %s826_s24 = smov [#allocation5]  }
   0xb   : > { %s1123_s21 = scalar_select %p889_p4, 1, 0 }
   0xc   : > { %s1124_s22 = scalar_select %p894_p6, 1, 0 }
   0xd   : > { %p899_p8 = pnand %p533_p5, %p141_p7  ;;  %s153_s25 = sshll.u32 %s826_s24, 4  ;;  %s903_s25 = int_to_ptr.vmem [resolvable:$true] %s153_s25 }
   0xe   : > { %s827_s27 = smov [#allocation7]   ;;  %s668_s5 = scalar_lea.hbm %s1116_s1, 256 }
   0xf   : > { %p609_p9 = pneg %p899_p8  ;;  %s166_s28 = sshll.u32 %s827_s27, 4  ;;  %s914_s28 = int_to_ptr.vmem [resolvable:$true] %s166_s28 }
  0x10   : > { %p669_p12 = scmp.ne.s32.totalorder %s1116_s1, %s668_s5  ;;  %p675_p5 = scmp.lt.u32.totalorder %s668_s5, %s1116_s1 }
  0x11   : > { %p910_p11 = pnand %p609_p9, %p1120_p1 }
  0x13   : > { %p670_p13 = pneg %p910_p11 }
  0x15   : > { %p671_p0 = pnand %p670_p13, %p669_p12 }
  0x17   : > { %p672_p3 = pneg %p671_p0 }
  0x19   : > { %p677_p7 = pnand %p675_p5, %p672_p3 }
  0x1b   : > { %680 = shalt.err (!%p677_p7)
}
  0x1c   : > { %s681_s10 = scalar_lea.vmem %s903_s25, 256  ;;  %p689_p2 = scmp.lt.s32.totalorder %s903_s25, %s903_s25 }
  0x1d   : > { %p682_p9 = scmp.ne.s32.totalorder %s903_s25, %s681_s10  ;;  %p690_p12 = scmp.lt.s32.totalorder %s681_s10, %s681_s10 }
  0x1f   : > { %p684_p10 = pnand %p682_p9, %p670_p13  ;;  %p691_p0 = por %p690_p12, %p689_p2 }
  0x21   : > { %p685_p1 = pneg %p684_p10 }
  0x23   : > { %p692_p6 = pnand %p691_p0, %p685_p1 }
  0x25   : > { %695 = shalt.err (!%p692_p6)
}
  0x26   : > { %s828_s11 = smov 128   ;;  %s829_s12 = smov 8  }
  0x27   : > { %612 = dma.hbm_to_vmem [thread:$0]  (!%p910_p11), %s1116_s1, 256, %s903_s25, [#allocation6], %s828_s11, %s828_s11, %s829_s12  }
  0x28   : > { %s696_s27 = scalar_lea.hbm %s1117_s2, 512 }
  0x29   : > { %p697_p1 = scmp.ne.s32.totalorder %s1117_s2, %s696_s27  ;;  %p703_p10 = scmp.lt.u32.totalorder %s696_s27, %s1117_s2 }
  0x2b   : > { %p699_p2 = pnand %p697_p1, %p670_p13 }
  0x2d   : > { %p700_p6 = pneg %p699_p2 }
  0x2f   : > { %p705_p3 = pnand %p703_p10, %p700_p6 }
  0x31   : > { %708 = shalt.err (!%p705_p3)
}
  0x32   : > { %s709_s25 = scalar_lea.vmem %s914_s28, 512  ;;  %p717_p12 = scmp.lt.s32.totalorder %s914_s28, %s914_s28 }
  0x33   : > { %p710_p5 = scmp.ne.s32.totalorder %s914_s28, %s709_s25  ;;  %p718_p0 = scmp.lt.s32.totalorder %s709_s25, %s709_s25 }
  0x35   : > { %p712_p7 = pnand %p710_p5, %p670_p13  ;;  %p719_p1 = por %p718_p0, %p717_p12 }
  0x37   : > { %p713_p9 = pneg %p712_p7 }
  0x39   : > { %p720_p2 = pnand %p719_p1, %p713_p9 }
  0x3b   : > { %723 = shalt.err (!%p720_p2)
}
  0x3c   : > { %615 = dma.hbm_to_vmem [thread:$0]  (!%p910_p11), %s1117_s2, 512, %s914_s28, [#allocation6], %s828_s11, %s828_s11, %s829_s12  }
  0x3d   : > { %s975_s26 = sadd.s32 1, %s824_s18   ;;  %s28_s9 = sadd.s32 1, %s820_s17 }
  0x3e   : > { %s25_s10 = ssub.s32 %s824_s18, %s975_s26  ;;  %p35_p13 = scmp.ne.s32.totalorder %s820_s17, %s816_s16 }
  0x3f   : > { %p26_p6 = scmp.eq.s32.totalorder %s25_s10, 0  ;;  %p36_p10 = scmp.eq.s32.totalorder %s824_s18, 0 }
  0x40   : > { %p1127_p3 = scmp.eq.s32.totalorder %s880_s19, 1  ;;  %p626_p7 = scmp.lt.s32.totalorder %s824_s18, 2 }
  0x41   : > { %s991_s14 = scalar_select %p26_p6, %s820_s17, %s28_s9  }
  0x42   : > { %p985_p5 = por %p1127_p3, %p35_p13  ;;  %p37_p9 = por %p36_p10, %p35_p13 }
  0x43   : > { %s183_s20 = sand.u32 1, %s820_s17   ;;  %s555_s28 = sshll.u32 %s824_s18, 8 }
  0x44   : > { %s1128_s13 = scalar_select %p985_p5, 1, 0 }
  0x45   : > { %s537_s24 = sshll.u32 %s183_s20, 4  ;;  %s998_s30 = scalar_lea.hbm %s1115_s0, %s555_s28 }
  0x46   : > { %s187_s5 = scalar_lea.vmem [#allocation2], %s537_s24  ;;  %p1002_p11 = pnand %p626_p7, %p37_p9 }
  0x47   : > { %s194_s6 = sshll.u32 %s187_s5, 4  ;;  %s1006_s7 = scalar_lea.sflag [#allocation3], %s183_s20  ;;  %s1000_s6 = int_to_ptr.vmem [resolvable:$true] %s194_s6 }
  0x48   : > { %s724_s8 = scalar_lea.hbm %s998_s30, 256  ;;  %p726_p0 = pneg %p1002_p11 }
  0x49   : > { %p725_p12 = scmp.ne.s32.totalorder %s998_s30, %s724_s8  ;;  %s729_s24 = scalar_lea.hbm %s1115_s0, 512 }
  0x4a   : > { %p730_p13 = scmp.lt.u32.totalorder %s998_s30, %s1115_s0  ;;  %p731_p6 = scmp.lt.u32.totalorder %s729_s24, %s724_s8 }
  0x4b   : > { %p727_p1 = pnand %p726_p0, %p725_p12  ;;  %p733_p3 = scmp.lt.u32.totalorder %s724_s8, %s998_s30 }
  0x4c   : > { %p732_p10 = por %p731_p6, %p730_p13 }
  0x4d   : > { %p728_p2 = pneg %p727_p1 }
  0x4e   : > { %p734_p7 = por %p733_p3, %p732_p10 }
  0x50   : > { %p735_p9 = pnand %p734_p7, %p728_p2 }
  0x52   : > { %738 = shalt.err (!%p735_p9)
}
  0x53   : > { %s739_s20 = scalar_lea.vmem %s1000_s6, 256  ;;  %s830_s29 = smov [#allocation2]  }
  0x54   : > { %p740_p12 = scmp.ne.s32.totalorder %s1000_s6, %s739_s20  ;;  %s744_s5 = sshll.u32 %s830_s29, 4  ;;  %s745_s5 = int_to_ptr.vmem [resolvable:$false] %s744_s5 }
  0x55   : > { %s746_s9 = scalar_lea.vmem %s745_s5, 512  ;;  %p747_p4 = scmp.lt.s32.totalorder %s1000_s6, %s745_s5 }
  0x56   : > { %p742_p1 = pnand %p740_p12, %p726_p0  ;;  %p748_p13 = scmp.lt.s32.totalorder %s746_s9, %s739_s20 }
  0x58   : > { %p743_p5 = pneg %p742_p1  ;;  %p749_p6 = por %p748_p13, %p747_p4 }
  0x5a   : > { %p750_p10 = pnand %p749_p6, %p743_p5 }
  0x5c   : > { %753 = shalt.err (!%p750_p10)
}
  0x5d   : > { %619 = dma.hbm_to_vmem [thread:$0]  (!%p1002_p11), %s998_s30, 256, %s1000_s6, %s1006_s7, %s828_s11, %s828_s11, %s829_s12  }
  0x5e   : > { %206 = sbr.rel (%p899_p8) target bundleno = 556 (0x22c), region = 36  ;;  %s1040_s8 = sand.u32 (!%p899_p8), 1, %s816_s16  }
  0x5f   : > { %s541_s10 = sshll.u32 (!%p899_p8), %s1040_s8, 4  ;;  %s209_s24 = scalar_lea.sflag (!%p899_p8), [#allocation3], %s1040_s8 }
  0x60   : > { %s212_s25 = scalar_lea.vmem (!%p899_p8), [#allocation2], %s541_s10  ;;  %p1130_p4 = scmp.ne.s32.totalorder (!%p899_p8), %s1123_s21, 0 }
  0x65   : > { %799 = dma.done.wait (%p1130_p4), %s209_s24, 256  }
  0x66   : > { %801 = vsyncadd (%p1130_p4), %s209_s24, 4294967040  ;;  %p1131_p5 = scmp.eq.s32.totalorder %s880_s19, 0 }
  0x68   : > { %803 = dma.done.wait (%p1131_p5), [#allocation6], 768   ;;  %p1132_p8 = pmov %p1131_p5 }
  0x69   : > { %vm254_vm0 = vcmask 130048   ;;  %v245_v0 = vld [vmem:[%s212_s25] sm:$0xff]  ;;  %v246_v1 = vld [vmem:[%s212_s25 + $0x8] sm:$0xff]  ;;  %vm342_vm1 = vcmask 261120   ;;  %s244_s21 = scalar_lea.vmem [#allocation8], %s541_s10  ;;  %s556_s30 = sshll.u32 %s880_s19, 8 }
  0x6a   : > { %805 = vsyncadd (%p1132_p8), [#allocation6], 4294966528  ;;  %v252_v2 = vld [vmem:[#allocation5] sm:$0xff]  ;;  %v585_v3 = vpack.c.bf16 %v246_v1, %v245_v0  ;;  %v247_v4 = vld [vmem:[#allocation7] sm:$0xff]  ;;  %s440_s23 = sshll.u32 %s244_s21, 4  ;;  %s1069_s28 = scalar_lea.hbm %s1119_s4, %s556_s30  ;;  %s1064_s23 = int_to_ptr.vmem [resolvable:$true] %s440_s23 }
  0x6b   : > { %571 = vmatprep.mubr.msk.f32.mxu0 %vm254_vm0, %v252_v2  ;;  %v248_v5 = vld [vmem:[#allocation7 + $0x8] sm:$0xff]  ;;  %v249_v7 = vld [vmem:[#allocation7 + $0x10] sm:$0xff]  ;;  %v250_v8 = vld [vmem:[#allocation7 + $0x18] sm:$0xff]  ;;  %s427_s27 = scalar_lea.sflag [#allocation4], %s1040_s8  ;;  %s754_s19 = scalar_lea.vmem %s1064_s23, 256 }
  0x6c   : > { %v589_v6 = vpack.c.bf16 %v248_v5, %v247_v4  ;;  %586 = vmatprep.subr.bf16.mxu0 %v585_v3  ;;  %v593_v9 = vpack.c.bf16 %v250_v8, %v249_v7  ;;  %v253_v10 = vld [vmem:[#allocation5 + $0x8] sm:$0xff]  ;;  %v547_v13 = vld [vmem:[%s1118_s3] ss:$0 sm:$0xff]  ;;  %p755_p11 = scmp.ne.s32.totalorder %s1064_s23, %s754_s19  ;;  %p1133_p0 = scmp.ne.s32.totalorder %s1128_s13, 0 }
  0x6d   : > { %588 = vmatpush3.bf16.msra.mxu0 %v585_v3  ;;  %s831_s20 = smov [#allocation8]  }
  0x6e   : > { %590 = vmatprep.subr.bf16.mxu1 %v589_v6  ;;  %p756_p2 = pnand %p755_p11, %p1133_p0  ;;  %s758_s29 = sshll.u32 %s831_s20, 4  ;;  %s759_s29 = int_to_ptr.vmem [resolvable:$false] %s758_s29 }
  0x6f   : > { %592 = vmatpush3.bf16.msra.mxu1 %v589_v6  ;;  %s760_s5 = scalar_lea.vmem %s759_s29, 512  ;;  %p761_p7 = scmp.lt.s32.totalorder %s1064_s23, %s759_s29 }
  0x70   : > { %594 = vmatprep.subr.bf16.mxu1 %v593_v9  ;;  %572 = vmatmul.mubr.msk.f32.vlgmr.msra.gmra.mrb[0].mxu0 %vm254_vm0, %v253_v10  ;;  %p757_p3 = pneg %p756_p2  ;;  %p762_p9 = scmp.lt.s32.totalorder %s760_s5, %s754_s19 }
  0x72   : > { %p763_p12 = por %p762_p9, %p761_p7 }
  0x73   : > { %596 = vmatpush3.bf16.msra.mxu1 %v593_v9 }
  0x74   : > { %p764_p1 = pnand %p763_p12, %p757_p3 }
 0x143   : > { %v573_v11 = vpop.f32.mrb[0].mxu0 }
 0x144   : > { %v327_v12 = vpop.f32.mrb[1].mxu0 }
 0x145   : > { %582 = vmatprep.mubr.msk.f32.mxu1 %vm342_vm1, %v327_v12 }
 0x146   : > { %583 = vmatmul.mubr.msk.f32.vlgmr.msra.gmra.mrb[0].mxu1 %vm342_vm1, %v573_v11 }
 0x219   : > { %v584_v14 = vpop.f32.mrb[0].mxu1 }
 0x21a   : > { %v421_v15 = vadd.f32 %v584_v14, %v547_v13  ;;  %v415_v16 = vpop.f32.mrb[1].mxu1 }
 0x21b   : > { %v416_v17 = vadd.f32 %v547_v13, %v415_v16 }
 0x21c   : > { %425 = vst.msk [vmem:[%s244_s21 + $0x8] sm:$0xff] %vm342_vm1, %v421_v15 }
 0x21d   : > { %424 = vst.msk [vmem:[%s244_s21] sm:$0xff] %vm342_vm1, %v416_v17 }
 0x21e   : > { %767 = shalt.err (!%p764_p1)
}
 0x21f   : > { %s768_s9 = scalar_lea.hbm %s1069_s28, 256  ;;  %s772_s25 = scalar_lea.hbm %s1119_s4, 512 }
 0x220   : > { %p769_p13 = scmp.ne.s32.totalorder %s1069_s28, %s768_s9  ;;  %p773_p4 = scmp.lt.u32.totalorder %s1069_s28, %s1119_s4 }
 0x221   : > { %p774_p5 = scmp.lt.u32.totalorder %s772_s25, %s768_s9  ;;  %p776_p11 = scmp.lt.u32.totalorder %s768_s9, %s1069_s28 }
 0x222   : > { %p770_p6 = pnand %p769_p13, %p1133_p0 }
 0x223   : > { %p775_p8 = por %p774_p5, %p773_p4 }
 0x224   : > { %p771_p10 = pneg %p770_p6 }
 0x225   : > { %p777_p2 = por %p776_p11, %p775_p8 }
 0x227   : > { %p778_p3 = pnand %p777_p2, %p771_p10 }
 0x229   : > { %781 = shalt.err (!%p778_p3)
}
 0x22a   : > { %s832_s12 = smov 128   ;;  %s833_s30 = smov 8  }
 0x22b   : > { %607 = dma.vmem_to_hbm [thread:$0]  (%p1133_p0), %s1064_s23, 256, %s1069_s28, %s427_s27, %s832_s12, %s832_s12, %s833_s30  }
 0x22c PF: > { %s455_s6 = sand.u32 1, %s812_s15   ;;  %p1134_p7 = scmp.ne.s32.totalorder %s1124_s22, 0 }
 0x22d   : > { %p1135_p9 = scmp.ge.s32.totalorder %s824_s18, 2  ;;  %s456_s7 = scalar_lea.sflag [#allocation4], %s455_s6 }
 0x22f   : > { %p621_p12 = pnand %p1135_p9, %p1134_p7 }
 0x231   : > { %807 = dma.done.wait (!%p621_p12), %s456_s7, 256  }
 0x232   : > { %809 = vsyncadd (!%p621_p12), %s456_s7, 4294967040  ;;  %p18_p1 = scmp.ge.s32.totalorder %s975_s26, 4   ;;  %s1136_s15 = smov %s816_s16 }
 0x233   : > { %s1137_s16 = smov %s820_s17  ;;  %s1138_s17 = smov %s991_s14 }
 0x234   : > { %s1139_s18 = smov %s975_s26  ;;  %20 = sbr.rel (!%p18_p1) target bundleno = 6 (0x6), region = 89 }
 0x23b   :  { %461 = vsyncpa [#allocation3], 1 }
 0x23c   :  { %463 = vsyncpa [#allocation3 + $0x1], 1 }
 0x23d   :  { %464 = vsyncpa [#allocation6], 1 }
 0x23e   :  { %465 = vsyncpa [#allocation4], 1 }
 0x23f   :  { %467 = vsyncpa [#allocation4 + $0x1], 1 }

// kernel: tpu_custom_call.1
= control target key start
LH: loop header
LB: loop body
LE: loop exit
PB: predicated region body
PF: predicated region fallthrough
CT: control target
= control target key end

     0   :  { %9 = vsyncpa [#allocation3], 0  ;;  %s1115_s0 = inlined_call_operand.hbm [shape: f32[2,16,32], index: 0, kind: input, shape index: {}]   ;;  %s1116_s1 = inlined_call_operand.hbm [shape: f32[16,16], index: 1, kind: input, shape index: {}]   ;;  %s1117_s2 = inlined_call_operand.hbm [shape: f32[32,32], index: 2, kind: input, shape index: {}]   ;;  %s1118_s3 = inlined_call_operand.vmem [shape: f32[1,32], index: 3, kind: input, shape index: {}]   ;;  %s1119_s4 = inlined_call_operand.hbm [shape: f32[2,16,32], index: 4, kind: output, shape index: {}]  }
   0x1   :  { %11 = vsyncpa [#allocation3 + $0x1], 0 }
   0x2   :  { %12 = vsyncpa [#allocation6], 0 }
   0x3   :  { %13 = vsyncpa [#allocation4], 0 }
   0x4   :  { %15 = vsyncpa [#allocation4 + $0x1], 0  ;;  %s859_s15 = smov 0   ;;  %s861_s16 = smov 0  }
   0x5   :  { %s863_s17 = smov 0   ;;  %s865_s18 = smov 0  }
   0x6 LB: > { %s880_s19 = sadd.s32 4294967295, %s824_s18   ;;  %s532_s20 = sadd.s32 4294967294, %s824_s18   ;;  %s824_s18 = sphi %s865_s18, %s1139_s18   ;;  %s820_s17 = sphi %s863_s17, %s1138_s17   ;;  %s816_s16 = sphi %s861_s16, %s1137_s16   ;;  %s812_s15 = sphi %s859_s15, %s1136_s15  }
   0x7   : > { %p41_p0 = scmp.ne.s32.totalorder %s816_s16, %s812_s15  ;;  %p1120_p1 = scmp.eq.s32.totalorder %s880_s19, 0 }
   0x8   : > { %p134_p3 = scmp.eq.s32.totalorder %s532_s20, 1  ;;  %p533_p5 = scmp.ge.s32.totalorder %s824_s18, 1 }
   0x9   : > { %p889_p4 = por %p1120_p1, %p41_p0  ;;  %p141_p7 = scmp.lt.s32.totalorder %s824_s18, 3 }
   0xa   : > { %p894_p6 = por %p134_p3, %p41_p0  ;;  %s826_s24 = smov [#allocation5]  }
   0xb   : > { %s1123_s21 = scalar_select %p889_p4, 1, 0 }
   0xc   : > { %s1124_s22 = scalar_select %p894_p6, 1, 0 }
   0xd   : > { %p899_p8 = pnand %p533_p5, %p141_p7  ;;  %s153_s25 = sshll.u32 %s826_s24, 4  ;;  %s903_s25 = int_to_ptr.vmem [resolvable:$true] %s153_s25 }
   0xe   : > { %s827_s27 = smov [#allocation7]   ;;  %s668_s5 = scalar_lea.hbm %s1116_s1, 256 }
   0xf   : > { %p609_p9 = pneg %p899_p8  ;;  %s166_s28 = sshll.u32 %s827_s27, 4  ;;  %s914_s28 = int_to_ptr.vmem [resolvable:$true] %s166_s28 }
  0x10   : > { %p669_p12 = scmp.ne.s32.totalorder %s1116_s1, %s668_s5  ;;  %p675_p5 = scmp.lt.u32.totalorder %s668_s5, %s1116_s1 }
  0x11   : > { %p910_p11 = pnand %p609_p9, %p1120_p1 }
  0x13   : > { %p670_p13 = pneg %p910_p11 }
  0x15   : > { %p671_p0 = pnand %p670_p13, %p669_p12 }
  0x17   : > { %p672_p3 = pneg %p671_p0 }
  0x19   : > { %p677_p7 = pnand %p675_p5, %p672_p3 }
  0x1b   : > { %680 = shalt.err (!%p677_p7)
}
  0x1c   : > { %s681_s10 = scalar_lea.vmem %s903_s25, 256  ;;  %p689_p2 = scmp.lt.s32.totalorder %s903_s25, %s903_s25 }
  0x1d   : > { %p682_p9 = scmp.ne.s32.totalorder %s903_s25, %s681_s10  ;;  %p690_p12 = scmp.lt.s32.totalorder %s681_s10, %s681_s10 }
  0x1f   : > { %p684_p10 = pnand %p682_p9, %p670_p13  ;;  %p691_p0 = por %p690_p12, %p689_p2 }
  0x21   : > { %p685_p1 = pneg %p684_p10 }
  0x23   : > { %p692_p6 = pnand %p691_p0, %p685_p1 }
  0x25   : > { %695 = shalt.err (!%p692_p6)
}
  0x26   : > { %s828_s11 = smov 128   ;;  %s829_s12 = smov 8  }
  0x27   : > { %612 = dma.hbm_to_vmem [thread:$0]  (!%p910_p11), %s1116_s1, 256, %s903_s25, [#allocation6], %s828_s11, %s828_s11, %s829_s12  }
  0x28   : > { %s696_s27 = scalar_lea.hbm %s1117_s2, 512 }
  0x29   : > { %p697_p1 = scmp.ne.s32.totalorder %s1117_s2, %s696_s27  ;;  %p703_p10 = scmp.lt.u32.totalorder %s696_s27, %s1117_s2 }
  0x2b   : > { %p699_p2 = pnand %p697_p1, %p670_p13 }
  0x2d   : > { %p700_p6 = pneg %p699_p2 }
  0x2f   : > { %p705_p3 = pnand %p703_p10, %p700_p6 }
  0x31   : > { %708 = shalt.err (!%p705_p3)
}
  0x32   : > { %s709_s25 = scalar_lea.vmem %s914_s28, 512  ;;  %p717_p12 = scmp.lt.s32.totalorder %s914_s28, %s914_s28 }
  0x33   : > { %p710_p5 = scmp.ne.s32.totalorder %s914_s28, %s709_s25  ;;  %p718_p0 = scmp.lt.s32.totalorder %s709_s25, %s709_s25 }
  0x35   : > { %p712_p7 = pnand %p710_p5, %p670_p13  ;;  %p719_p1 = por %p718_p0, %p717_p12 }
  0x37   : > { %p713_p9 = pneg %p712_p7 }
  0x39   : > { %p720_p2 = pnand %p719_p1, %p713_p9 }
  0x3b   : > { %723 = shalt.err (!%p720_p2)
}
  0x3c   : > { %615 = dma.hbm_to_vmem [thread:$0]  (!%p910_p11), %s1117_s2, 512, %s914_s28, [#allocation6], %s828_s11, %s828_s11, %s829_s12  }
  0x3d   : > { %s975_s26 = sadd.s32 1, %s824_s18   ;;  %s28_s9 = sadd.s32 1, %s820_s17 }
  0x3e   : > { %s25_s10 = ssub.s32 %s824_s18, %s975_s26  ;;  %p35_p13 = scmp.ne.s32.totalorder %s820_s17, %s816_s16 }
  0x3f   : > { %p26_p6 = scmp.eq.s32.totalorder %s25_s10, 0  ;;  %p36_p10 = scmp.eq.s32.totalorder %s824_s18, 0 }
  0x40   : > { %p1127_p3 = scmp.eq.s32.totalorder %s880_s19, 1  ;;  %p626_p7 = scmp.lt.s32.totalorder %s824_s18, 2 }
  0x41   : > { %s991_s14 = scalar_select %p26_p6, %s820_s17, %s28_s9  }
  0x42   : > { %p985_p5 = por %p1127_p3, %p35_p13  ;;  %p37_p9 = por %p36_p10, %p35_p13 }
  0x43   : > { %s183_s20 = sand.u32 1, %s820_s17   ;;  %s555_s28 = sshll.u32 %s824_s18, 8 }
  0x44   : > { %s1128_s13 = scalar_select %p985_p5, 1, 0 }
  0x45   : > { %s537_s24 = sshll.u32 %s183_s20, 4  ;;  %s998_s30 = scalar_lea.hbm %s1115_s0, %s555_s28 }
  0x46   : > { %s187_s5 = scalar_lea.vmem [#allocation2], %s537_s24  ;;  %p1002_p11 = pnand %p626_p7, %p37_p9 }
  0x47   : > { %s194_s6 = sshll.u32 %s187_s5, 4  ;;  %s1006_s7 = scalar_lea.sflag [#allocation3], %s183_s20  ;;  %s1000_s6 = int_to_ptr.vmem [resolvable:$true] %s194_s6 }
  0x48   : > { %s724_s8 = scalar_lea.hbm %s998_s30, 256  ;;  %p726_p0 = pneg %p1002_p11 }
  0x49   : > { %p725_p12 = scmp.ne.s32.totalorder %s998_s30, %s724_s8  ;;  %s729_s24 = scalar_lea.hbm %s1115_s0, 512 }
  0x4a   : > { %p730_p13 = scmp.lt.u32.totalorder %s998_s30, %s1115_s0  ;;  %p731_p6 = scmp.lt.u32.totalorder %s729_s24, %s724_s8 }
  0x4b   : > { %p727_p1 = pnand %p726_p0, %p725_p12  ;;  %p733_p3 = scmp.lt.u32.totalorder %s724_s8, %s998_s30 }
  0x4c   : > { %p732_p10 = por %p731_p6, %p730_p13 }
  0x4d   : > { %p728_p2 = pneg %p727_p1 }
  0x4e   : > { %p734_p7 = por %p733_p3, %p732_p10 }
  0x50   : > { %p735_p9 = pnand %p734_p7, %p728_p2 }
  0x52   : > { %738 = shalt.err (!%p735_p9)
}
  0x53   : > { %s739_s20 = scalar_lea.vmem %s1000_s6, 256  ;;  %s830_s29 = smov [#allocation2]  }
  0x54   : > { %p740_p12 = scmp.ne.s32.totalorder %s1000_s6, %s739_s20  ;;  %s744_s5 = sshll.u32 %s830_s29, 4  ;;  %s745_s5 = int_to_ptr.vmem [resolvable:$false] %s744_s5 }
  0x55   : > { %s746_s9 = scalar_lea.vmem %s745_s5, 512  ;;  %p747_p4 = scmp.lt.s32.totalorder %s1000_s6, %s745_s5 }
  0x56   : > { %p742_p1 = pnand %p740_p12, %p726_p0  ;;  %p748_p13 = scmp.lt.s32.totalorder %s746_s9, %s739_s20 }
  0x58   : > { %p743_p5 = pneg %p742_p1  ;;  %p749_p6 = por %p748_p13, %p747_p4 }
  0x5a   : > { %p750_p10 = pnand %p749_p6, %p743_p5 }
  0x5c   : > { %753 = shalt.err (!%p750_p10)
}
  0x5d   : > { %619 = dma.hbm_to_vmem [thread:$0]  (!%p1002_p11), %s998_s30, 256, %s1000_s6, %s1006_s7, %s828_s11, %s828_s11, %s829_s12  }
  0x5e   : > { %206 = sbr.rel (%p899_p8) target bundleno = 556 (0x22c), region = 36  ;;  %s1040_s8 = sand.u32 (!%p899_p8), 1, %s816_s16  }
  0x5f   : > { %s541_s10 = sshll.u32 (!%p899_p8), %s1040_s8, 4  ;;  %s209_s24 = scalar_lea.sflag (!%p899_p8), [#allocation3], %s1040_s8 }
  0x60   : > { %s212_s25 = scalar_lea.vmem (!%p899_p8), [#allocation2], %s541_s10  ;;  %p1130_p4 = scmp.ne.s32.totalorder (!%p899_p8), %s1123_s21, 0 }
  0x65   : > { %799 = dma.done.wait (%p1130_p4), %s209_s24, 256  }
  0x66   : > { %801 = vsyncadd (%p1130_p4), %s209_s24, 4294967040  ;;  %p1131_p5 = scmp.eq.s32.totalorder %s880_s19, 0 }
  0x68   : > { %803 = dma.done.wait (%p1131_p5), [#allocation6], 768   ;;  %p1132_p8 = pmov %p1131_p5 }
  0x69   : > { %vm254_vm0 = vcmask 130048   ;;  %v245_v0 = vld [vmem:[%s212_s25] sm:$0xff]  ;;  %v246_v1 = vld [vmem:[%s212_s25 + $0x8] sm:$0xff]  ;;  %vm342_vm1 = vcmask 261120   ;;  %s244_s21 = scalar_lea.vmem [#allocation8], %s541_s10  ;;  %s556_s30 = sshll.u32 %s880_s19, 8 }
  0x6a   : > { %805 = vsyncadd (%p1132_p8), [#allocation6], 4294966528  ;;  %v252_v2 = vld [vmem:[#allocation5] sm:$0xff]  ;;  %v585_v3 = vpack.c.bf16 %v246_v1, %v245_v0  ;;  %v247_v4 = vld [vmem:[#allocation7] sm:$0xff]  ;;  %s440_s23 = sshll.u32 %s244_s21, 4  ;;  %s1069_s28 = scalar_lea.hbm %s1119_s4, %s556_s30  ;;  %s1064_s23 = int_to_ptr.vmem [resolvable:$true] %s440_s23 }
  0x6b   : > { %571 = vmatprep.mubr.msk.f32.mxu0 %vm254_vm0, %v252_v2  ;;  %v248_v5 = vld [vmem:[#allocation7 + $0x8] sm:$0xff]  ;;  %v249_v7 = vld [vmem:[#allocation7 + $0x10] sm:$0xff]  ;;  %v250_v8 = vld [vmem:[#allocation7 + $0x18] sm:$0xff]  ;;  %s427_s27 = scalar_lea.sflag [#allocation4], %s1040_s8  ;;  %s754_s19 = scalar_lea.vmem %s1064_s23, 256 }
  0x6c   : > { %v589_v6 = vpack.c.bf16 %v248_v5, %v247_v4  ;;  %586 = vmatprep.subr.bf16.mxu0 %v585_v3  ;;  %v593_v9 = vpack.c.bf16 %v250_v8, %v249_v7  ;;  %v253_v10 = vld [vmem:[#allocation5 + $0x8] sm:$0xff]  ;;  %v547_v13 = vld [vmem:[%s1118_s3] ss:$0 sm:$0xff]  ;;  %p755_p11 = scmp.ne.s32.totalorder %s1064_s23, %s754_s19  ;;  %p1133_p0 = scmp.ne.s32.totalorder %s1128_s13, 0 }
  0x6d   : > { %588 = vmatpush3.bf16.msra.mxu0 %v585_v3  ;;  %s831_s20 = smov [#allocation8]  }
  0x6e   : > { %590 = vmatprep.subr.bf16.mxu1 %v589_v6  ;;  %p756_p2 = pnand %p755_p11, %p1133_p0  ;;  %s758_s29 = sshll.u32 %s831_s20, 4  ;;  %s759_s29 = int_to_ptr.vmem [resolvable:$false] %s758_s29 }
  0x6f   : > { %592 = vmatpush3.bf16.msra.mxu1 %v589_v6  ;;  %s760_s5 = scalar_lea.vmem %s759_s29, 512  ;;  %p761_p7 = scmp.lt.s32.totalorder %s1064_s23, %s759_s29 }
  0x70   : > { %594 = vmatprep.subr.bf16.mxu1 %v593_v9  ;;  %572 = vmatmul.mubr.msk.f32.vlgmr.msra.gmra.mrb[0].mxu0 %vm254_vm0, %v253_v10  ;;  %p757_p3 = pneg %p756_p2  ;;  %p762_p9 = scmp.lt.s32.totalorder %s760_s5, %s754_s19 }
  0x72   : > { %p763_p12 = por %p762_p9, %p761_p7 }
  0x73   : > { %596 = vmatpush3.bf16.msra.mxu1 %v593_v9 }
  0x74   : > { %p764_p1 = pnand %p763_p12, %p757_p3 }
 0x143   : > { %v573_v11 = vpop.f32.mrb[0].mxu0 }
 0x144   : > { %v327_v12 = vpop.f32.mrb[1].mxu0 }
 0x145   : > { %582 = vmatprep.mubr.msk.f32.mxu1 %vm342_vm1, %v327_v12 }
 0x146   : > { %583 = vmatmul.mubr.msk.f32.vlgmr.msra.gmra.mrb[0].mxu1 %vm342_vm1, %v573_v11 }
 0x219   : > { %v584_v14 = vpop.f32.mrb[0].mxu1 }
 0x21a   : > { %v421_v15 = vadd.f32 %v584_v14, %v547_v13  ;;  %v415_v16 = vpop.f32.mrb[1].mxu1 }
 0x21b   : > { %v416_v17 = vadd.f32 %v547_v13, %v415_v16 }
 0x21c   : > { %425 = vst.msk [vmem:[%s244_s21 + $0x8] sm:$0xff] %vm342_vm1, %v421_v15 }
 0x21d   : > { %424 = vst.msk [vmem:[%s244_s21] sm:$0xff] %vm342_vm1, %v416_v17 }
 0x21e   : > { %767 = shalt.err (!%p764_p1)
}
 0x21f   : > { %s768_s9 = scalar_lea.hbm %s1069_s28, 256  ;;  %s772_s25 = scalar_lea.hbm %s1119_s4, 512 }
 0x220   : > { %p769_p13 = scmp.ne.s32.totalorder %s1069_s28, %s768_s9  ;;  %p773_p4 = scmp.lt.u32.totalorder %s1069_s28, %s1119_s4 }
 0x221   : > { %p774_p5 = scmp.lt.u32.totalorder %s772_s25, %s768_s9  ;;  %p776_p11 = scmp.lt.u32.totalorder %s768_s9, %s1069_s28 }
 0x222   : > { %p770_p6 = pnand %p769_p13, %p1133_p0 }
 0x223   : > { %p775_p8 = por %p774_p5, %p773_p4 }
 0x224   : > { %p771_p10 = pneg %p770_p6 }
 0x225   : > { %p777_p2 = por %p776_p11, %p775_p8 }
 0x227   : > { %p778_p3 = pnand %p777_p2, %p771_p10 }
 0x229   : > { %781 = shalt.err (!%p778_p3)
}
 0x22a   : > { %s832_s12 = smov 128   ;;  %s833_s30 = smov 8  }
 0x22b   : > { %607 = dma.vmem_to_hbm [thread:$0]  (%p1133_p0), %s1064_s23, 256, %s1069_s28, %s427_s27, %s832_s12, %s832_s12, %s833_s30  }
 0x22c PF: > { %s455_s6 = sand.u32 1, %s812_s15   ;;  %p1134_p7 = scmp.ne.s32.totalorder %s1124_s22, 0 }
 0x22d   : > { %p1135_p9 = scmp.ge.s32.totalorder %s824_s18, 2  ;;  %s456_s7 = scalar_lea.sflag [#allocation4], %s455_s6 }
 0x22f   : > { %p621_p12 = pnand %p1135_p9, %p1134_p7 }
 0x231   : > { %807 = dma.done.wait (!%p621_p12), %s456_s7, 256  }
 0x232   : > { %809 = vsyncadd (!%p621_p12), %s456_s7, 4294967040  ;;  %p18_p1 = scmp.ge.s32.totalorder %s975_s26, 4   ;;  %s1136_s15 = smov %s816_s16 }
 0x233   : > { %s1137_s16 = smov %s820_s17  ;;  %s1138_s17 = smov %s991_s14 }
 0x234   : > { %s1139_s18 = smov %s975_s26  ;;  %20 = sbr.rel (!%p18_p1) target bundleno = 6 (0x6), region = 89 }
 0x23b   :  { %461 = vsyncpa [#allocation3], 1 }
 0x23c   :  { %463 = vsyncpa [#allocation3 + $0x1], 1 }
 0x23d   :  { %464 = vsyncpa [#allocation6], 1 }
 0x23e   :  { %465 = vsyncpa [#allocation4], 1 }
 0x23f   :  { %467 = vsyncpa [#allocation4 + $0x1], 1 }

</bundles_post_ra>
